<compile_context>
chip_gen: v7x
topology: tpu7x:2x2x1
jax: 0.10.0
libtpu: 0.0.40
codegen_flags: <defaults>
</compile_context>

<pallas_src>
import functools
import math

import jax
import jax.numpy as jnp
from jax.experimental import pallas as pl
from jax.experimental.pallas import tpu as pltpu


def _single(v):
    if isinstance(v, (tuple, list)):
        return int(v[0])
    return int(v)


def _round_up(x, m):
    return ((x + m - 1) // m) * m


def _pick_b_blk(b, bytes_per_row, budget_bytes=8 * 1024 * 1024):
    """Largest multiple-of-8 batch block that keeps the VMEM footprint modest."""
    blk = budget_bytes // max(int(bytes_per_row), 1)
    blk = max(8, min(256, (blk // 8) * 8))
    blk = min(blk, _round_up(b, 8))
    return max(blk, 8)


# --------------------------- fast path (s == k, p == 0) ---------------------------
def _unpool_fast_kernel(x_ref, idx_ref, o_ref, *, k):
    # x_ref, idx_ref: (b_blk, l_in_pad); o_ref: (k, b_blk, l_in_pad)  (all lane-dense)
    x = x_ref[...]
    idx = idx_ref[...]
    b_blk, l_in_pad = x.shape
    col = jax.lax.broadcasted_iota(jnp.int32, (b_blk, l_in_pad), 1)
    rel = idx - col * k                     # offset inside the length-k window
    zero = jnp.zeros((), x.dtype)
    for r in range(k):                      # k is small & static -> unrolled
        # out[b, i*k + r] = x[b, i] iff idx[b, i] == i*k + r ; else 0.
        o_ref[r, :, :] = jnp.where(rel == r, x, zero)


def _max_unpool1d_fast(x2, idx2, k, l_out):
    b, l_in = x2.shape
    # l_in_pad chosen so l_in_pad * k is a multiple of 128 (lane-dense output)
    # and the padded windows cover the whole requested l_out.
    q = 128 // math.gcd(k, 128)
    l_in_pad = _round_up(max(l_in, pl.cdiv(l_out, k)), q)
    if l_in_pad != l_in:
        x2 = jnp.pad(x2, ((0, 0), (0, l_in_pad - l_in)))
        idx2 = jnp.pad(idx2, ((0, 0), (0, l_in_pad - l_in)), constant_values=-1)

    itm = x2.dtype.itemsize
    bytes_per_row = (2 * 2 * l_in_pad * 4           # x + idx, double-buffered (idx i32)
                     + 2 * k * l_in_pad * itm       # output planes, double-buffered
                     + 2 * l_in_pad * 4)            # temporaries
    b_blk = _pick_b_blk(b, bytes_per_row)
    grid = (pl.cdiv(b, b_blk),)                     # no wrapper-side batch padding

    planes = pl.pallas_call(
        functools.partial(_unpool_fast_kernel, k=k),
        out_shape=jax.ShapeDtypeStruct((k, b, l_in_pad), x2.dtype),
        grid_spec=pltpu.PrefetchScalarGridSpec(
            num_scalar_prefetch=0,
            grid=grid,
            in_specs=[
                pl.BlockSpec((b_blk, l_in_pad), lambda i: (i, 0)),
                pl.BlockSpec((b_blk, l_in_pad), lambda i: (i, 0)),
            ],
            out_specs=pl.BlockSpec((k, b_blk, l_in_pad), lambda i: (0, i, 0)),
        ),
        compiler_params=pltpu.CompilerParams(
            dimension_semantics=("parallel",),
            vmem_limit_bytes=48 * 1024 * 1024,
        ),
    )(x2, idx2)

    # planes[r, b, i] -> out[b, i*k + r]: interleave via cheap XLA transpose+reshape.
    out = planes.transpose(1, 2, 0).reshape(b, l_in_pad * k)
    return out[:, :l_out]


# --------------------------- general path (any stride/padding) ---------------------------
def _unpool_general_kernel(x_ref, idx_ref, o_ref, *, t_out):
    # x_ref, idx_ref: (b_blk, l_in); o_ref: (b_blk, t_out) tile of the padded output.
    x = x_ref[...]
    idx = idx_ref[...]
    b_blk, l_in = x.shape
    j0 = pl.program_id(1) * t_out
    j = j0 + jax.lax.broadcasted_iota(jnp.int32, (b_blk, l_in, t_out), 2)
    hit = idx[:, :, None] == j
    contrib = jnp.where(hit, x[:, :, None], jnp.zeros((), x.dtype))
    # At most one hit per output position for maxpool-derived indices, so the
    # sum (done in the input dtype) is exact.
    o_ref[...] = jnp.sum(contrib, axis=1).astype(o_ref.dtype)


def _max_unpool1d_general(x2, idx2, l_out):
    b, l_in = x2.shape
    t_out = min(512, _round_up(l_out, 128))         # lane-dense output tiles
    l_out_pad = _round_up(l_out, t_out)

    itm = max(x2.dtype.itemsize, 4)
    bytes_per_row = (2 * 2 * l_in * 4               # x + idx, double-buffered
                     + 2 * t_out * itm              # output tile, double-buffered
                     + 2 * l_in * t_out * itm)      # hit/contrib intermediates
    b_blk = _pick_b_blk(b, bytes_per_row)
    grid = (pl.cdiv(b, b_blk), l_out_pad // t_out)

    out = pl.pallas_call(
        functools.partial(_unpool_general_kernel, t_out=t_out),
        out_shape=jax.ShapeDtypeStruct((b, l_out_pad), x2.dtype),
        grid_spec=pltpu.PrefetchScalarGridSpec(
            num_scalar_prefetch=0,
            grid=grid,
            in_specs=[
                pl.BlockSpec((b_blk, l_in), lambda i, j: (i, 0)),
                pl.BlockSpec((b_blk, l_in), lambda i, j: (i, 0)),
            ],
            out_specs=pl.BlockSpec((b_blk, t_out), lambda i, j: (i, j)),
        ),
        compiler_params=pltpu.CompilerParams(
            dimension_semantics=("parallel", "parallel"),
            vmem_limit_bytes=48 * 1024 * 1024,
        ),
    )(x2, idx2)
    return out[:, :l_out]


# --------------------------- public API ---------------------------
def max_unpool1d(x, indices, kernel_size, stride=None, padding=0, output_size=None):
    """Pallas implementation of F.max_unpool1d for NCL inputs."""
    k = _single(kernel_size)
    s = _single(stride if stride is not None else kernel_size)
    p = _single(padding)

    n, c, l_in = x.shape
    if output_size is not None:
        l_out = int(output_size[-1])
    else:
        l_out = (l_in - 1) * s - 2 * p + k

    b = n * c
    x2 = x.reshape(b, l_in)
    idx2 = indices.reshape(b, l_in).astype(jnp.int32)

    if s == k and p == 0:
        out2 = _max_unpool1d_fast(x2, idx2, k, l_out)
    else:
        # TODO(synk): the window-local fast path only covers stride==kernel_size
        # with padding==0; other configurations use the tiled compare-scatter path.
        out2 = _max_unpool1d_general(x2, idx2, l_out)
    return out2.reshape(n, c, l_out)


class MaxUnpool1d:
    """JAX/Pallas port of torch.nn.MaxUnpool1d (no learnable parameters)."""

    def __init__(self, kernel_size, stride=None, padding=0):
        self.kernel_size = _single(kernel_size)
        self.stride = _single(stride if stride is not None else kernel_size)
        self.padding = _single(padding)

    def __call__(self, input, indices, output_size=None):
        return max_unpool1d(input, indices, self.kernel_size, self.stride,
                            self.padding, output_size)

    def __repr__(self):
        return (self.__class__.__name__ + "(kernel_size=" + str(self.kernel_size)
                + ", stride=" + str(self.stride) + ", padding=" + str(self.padding) + ")")


# ---------- plain-JAX glue: MaxPool1d with return_indices (to build inputs) ----------
def maxpool1d_with_indices(x, kernel_size, stride=None, padding=0):
    """MaxPool1d returning PyTorch-style indices into the un-padded input axis."""
    k = _single(kernel_size)
    s = _single(stride if stride is not None else kernel_size)
    p = _single(padding)
    n, c, l = x.shape
    l_pool = (l + 2 * p - k) // s + 1
    xp = jnp.pad(x, ((0, 0), (0, 0), (p, p)), constant_values=-jnp.inf)
    win = jnp.arange(l_pool)[:, None] * s + jnp.arange(k)[None, :]   # padded coords
    windows = xp[:, :, win]                                          # (n, c, l_pool, k)
    vals = jnp.max(windows, axis=-1)
    amax = jnp.argmax(windows, axis=-1)
    idx = jnp.arange(l_pool)[None, None, :] * s + amax - p           # original coords
    return vals, idx.astype(jnp.int32)


def unpool1d_ref(vals, idx, l_out):
    """Plain-JAX scatter reference for F.max_unpool1d."""
    n, c, li = vals.shape
    b = n * c
    out = jnp.zeros((b, l_out), vals.dtype)
    rows = jnp.repeat(jnp.arange(b), li)
    out = out.at[rows, idx.reshape(-1)].set(vals.reshape(-1))
    return out.reshape(n, c, l_out)


if __name__ == "__main__":
    key = jax.random.PRNGKey(0)
    n, c, l = 2, 4, 16
    x = jax.random.normal(key, (n, c, l), dtype=jnp.float32)

    # --- fast path: MaxPool1d(2, stride=2) -> MaxUnpool1d(2, stride=2) ---
    pooled, indices = maxpool1d_with_indices(x, 2, 2)                 # (2, 4, 8)
    unpool = MaxUnpool1d(2, stride=2)
    out = jax.block_until_ready(unpool(pooled, indices))              # (2, 4, 16)
    ref = unpool1d_ref(pooled, indices, l)
    assert out.shape == (n, c, l)
    assert out.dtype == x.dtype
    assert jnp.allclose(out, ref), "fast path mismatch vs reference scatter"

    # --- fast path with explicit (larger) output_size ---
    out_big = jax.block_until_ready(unpool(pooled, indices, output_size=(n, c, 17)))
    assert out_big.shape == (n, c, 17)
    assert jnp.allclose(out_big[:, :, :l], ref)
    assert jnp.allclose(out_big[:, :, l:], 0.0)

    # --- general path: padding != 0 (MaxPool1d(2, stride=2, padding=1)) ---
    pooled_p, indices_p = maxpool1d_with_indices(x, 2, 2, padding=1)  # (2, 4, 9)
    unpool_p = MaxUnpool1d(2, stride=2, padding=1)
    out_p = jax.block_until_ready(unpool_p(pooled_p, indices_p))      # (2, 4, 16)
    ref_p = unpool1d_ref(pooled_p, indices_p, l)
    assert out_p.shape == (n, c, l)
    assert jnp.allclose(out_p, ref_p), "general path mismatch vs reference scatter"

    print("KERNEL_OK")
</pallas_src>

<mosaic_0001>
module attributes {stable_mosaic.version = 11 : i64} {
  func.func @_unpool_fast_kernel(%arg0: i32, %arg1: memref<8x64xf32, #tpu.memory_space<vmem>>, %arg2: memref<8x64xi32, #tpu.memory_space<vmem>>, %arg3: memref<2x8x64xf32, #tpu.memory_space<vmem>>) attributes {dimension_semantics = [#tpu.dimension_semantics<parallel>], iteration_bounds = array<i64: 1>, scalar_prefetch = 0 : i64, scratch_operands = 0 : i64, tpu.core_type = #tpu.core_type<tc>, window_params = [{transform_indices = @transform_0, window_bounds = array<i64: 8, 64>}, {transform_indices = @transform_1, window_bounds = array<i64: 8, 64>}, {transform_indices = @transform_2, window_bounds = array<i64: 2, 8, 64>}]} {
    %c0 = arith.constant 0 : index
    %c0_0 = arith.constant 0 : index
    %0 = vector.load %arg1[%c0, %c0_0] : memref<8x64xf32, #tpu.memory_space<vmem>>, vector<8x64xf32>
    %c0_1 = arith.constant 0 : index
    %c0_2 = arith.constant 0 : index
    %1 = vector.load %arg2[%c0_1, %c0_2] : memref<8x64xi32, #tpu.memory_space<vmem>>, vector<8x64xi32>
    %2 = tpu.iota {dimensions = array<i32: 1>} : vector<8x64xi32>
    %c2_i32 = arith.constant 2 : i32
    %3 = vector.broadcast %c2_i32 : i32 to vector<8x64xi32>
    %4 = arith.muli %2, %3 : vector<8x64xi32>
    %5 = arith.subi %1, %4 : vector<8x64xi32>
    %c0_i32 = arith.constant 0 : i32
    %6 = vector.broadcast %c0_i32 : i32 to vector<8x64xi32>
    %7 = arith.cmpi eq, %5, %6 : vector<8x64xi32>
    %cst = arith.constant 0.000000e+00 : f32
    %8 = vector.broadcast %cst : f32 to vector<8x64xf32>
    %9 = arith.select %7, %0, %8 : vector<8x64xi1>, vector<8x64xf32>
    %c0_3 = arith.constant 0 : index
    %c0_4 = arith.constant 0 : index
    %c0_5 = arith.constant 0 : index
    %10 = vector.load %arg3[%c0_3, %c0_4, %c0_5] : memref<2x8x64xf32, #tpu.memory_space<vmem>>, vector<1x8x64xf32>
    %11 = vector.shape_cast %10 : vector<1x8x64xf32> to vector<8x64xf32>
    %12 = vector.shape_cast %9 : vector<8x64xf32> to vector<1x8x64xf32>
    tpu.vector_store %arg3[%c0_3, %c0_4, %c0_5], %12 {strides = array<i32>} : memref<2x8x64xf32, #tpu.memory_space<vmem>>, vector<1x8x64xf32>,
    %c1_i32 = arith.constant 1 : i32
    %13 = vector.broadcast %c1_i32 : i32 to vector<8x64xi32>
    %14 = arith.cmpi eq, %5, %13 : vector<8x64xi32>
    %cst_6 = arith.constant 0.000000e+00 : f32
    %15 = vector.broadcast %cst_6 : f32 to vector<8x64xf32>
    %16 = arith.select %14, %0, %15 : vector<8x64xi1>, vector<8x64xf32>
    %c1 = arith.constant 1 : index
    %c0_7 = arith.constant 0 : index
    %c0_8 = arith.constant 0 : index
    %17 = vector.load %arg3[%c1, %c0_7, %c0_8] : memref<2x8x64xf32, #tpu.memory_space<vmem>>, vector<1x8x64xf32>
    %18 = vector.shape_cast %17 : vector<1x8x64xf32> to vector<8x64xf32>
    %19 = vector.shape_cast %16 : vector<8x64xf32> to vector<1x8x64xf32>
    tpu.vector_store %arg3[%c1, %c0_7, %c0_8], %19 {strides = array<i32>} : memref<2x8x64xf32, #tpu.memory_space<vmem>>, vector<1x8x64xf32>,
    return
  }
  func.func @transform_0(%arg0: i32) -> (i32, i32) {
    %c0_i32 = arith.constant 0 : i32
    %c0_i32_0 = arith.constant 0 : i32
    return %arg0, %c0_i32 : i32, i32
  }
  func.func @transform_1(%arg0: i32) -> (i32, i32) {
    %c0_i32 = arith.constant 0 : i32
    %c0_i32_0 = arith.constant 0 : i32
    return %arg0, %c0_i32 : i32, i32
  }
  func.func @transform_2(%arg0: i32) -> (i32, i32, i32) {
    %c0_i32 = arith.constant 0 : i32
    %c0_i32_0 = arith.constant 0 : i32
    %c0_i32_1 = arith.constant 0 : i32
    return %c0_i32, %arg0, %c0_i32_0 : i32, i32, i32
  }
}

</mosaic_0001>

<bundles_post_ra>
// kernel: tpu_custom_call.1
= control target key start
LH: loop header
LB: loop body
LE: loop exit
PB: predicated region body
PF: predicated region fallthrough
CT: control target
= control target key end

     0   :  { %7 = vsyncpa [#allocation3], 0  ;;  %s201_s0 = inlined_call_operand.hbm [shape: f32[8,64], index: 0, kind: input, shape index: {}]   ;;  %s202_s1 = inlined_call_operand.hbm [shape: s32[8,64], index: 1, kind: input, shape index: {}]   ;;  %s203_s2 = inlined_call_operand.hbm [shape: f32[2,8,64], index: 2, kind: output, shape index: {}]  }
   0x1   :  { %8 = vsyncpa [#allocation6], 0 }
   0x2   :  { %9 = vsyncpa [#allocation4], 0  ;;  %s145_s9 = smov [#allocation2]   ;;  %s146_s11 = smov [#allocation5]  }
   0x3   :  { %s16_s10 = sshll.u32 %s145_s9, 4  ;;  %s26_s12 = sshll.u32 %s146_s11, 4  ;;  %s17_s10 = int_to_ptr.vmem [resolvable:$true] %s16_s10  ;;  %s27_s12 = int_to_ptr.vmem [resolvable:$true] %s26_s12 }
   0x4   :  { %s73_s15 = scalar_lea.hbm %s201_s0, 128 }
   0x5   :  { %p74_p0 = scmp.ne.s32.totalorder %s201_s0, %s73_s15  ;;  %p77_p1 = scmp.lt.u32.totalorder %s73_s15, %s201_s0 }
   0x7   :  { %p79_p2 = pnand %p77_p1, %p74_p0 }
   0x9   :  { %82 = shalt.err (!%p79_p2)
}
   0xa   :  { %s83_s20 = scalar_lea.vmem %s17_s10, 128  ;;  %p88_p4 = scmp.lt.s32.totalorder %s17_s10, %s17_s10 }
   0xb   :  { %p84_p3 = scmp.ne.s32.totalorder %s17_s10, %s83_s20  ;;  %p89_p5 = scmp.lt.s32.totalorder %s83_s20, %s83_s20 }
   0xd   :  { %p90_p6 = por %p89_p5, %p88_p4 }
   0xf   :  { %p91_p7 = pnand %p90_p6, %p84_p3 }
  0x11   :  { %94 = shalt.err (!%p91_p7)
}
  0x12   :  { %19 = dma.hbm_to_vmem [thread:$0]  %s201_s0, 128, %s17_s10, [#allocation3]  }
  0x13   :  { %s95_s25 = scalar_lea.hbm %s202_s1, 128 }
  0x14   :  { %p96_p8 = scmp.ne.s32.totalorder %s202_s1, %s95_s25  ;;  %p99_p9 = scmp.lt.u32.totalorder %s95_s25, %s202_s1 }
  0x16   :  { %p101_p10 = pnand %p99_p9, %p96_p8 }
  0x18   :  { %104 = shalt.err (!%p101_p10)
}
  0x19   :  { %s105_s30 = scalar_lea.vmem %s27_s12, 128  ;;  %p110_p12 = scmp.lt.s32.totalorder %s27_s12, %s27_s12 }
  0x1a   :  { %p106_p11 = scmp.ne.s32.totalorder %s27_s12, %s105_s30  ;;  %p111_p13 = scmp.lt.s32.totalorder %s105_s30, %s105_s30 }
  0x1c   :  { %p112_p0 = por %p111_p13, %p110_p12 }
  0x1e   :  { %p113_p1 = pnand %p112_p0, %p106_p11 }
  0x20   :  { %116 = shalt.err (!%p113_p1)
}
  0x21   :  { %29 = dma.hbm_to_vmem [thread:$0]  %s202_s1, 128, %s27_s12, [#allocation6]  }
  0x22   :  { %139 = dma.done.wait [#allocation3], 128  }
  0x23   :  { %140 = vsyncadd [#allocation3], 4294967168 }
  0x24   :  { %141 = dma.done.wait [#allocation6], 128  }
  0x25   :  { %142 = vsyncadd [#allocation6], 4294967168  ;;  %v38_v0 = vlaneseq  ;;  %v37_v3 = vld [vmem:[#allocation5] sm:$0xff]  ;;  %s147_s4 = smov [#allocation7]   ;;  %v36_v4 = vld [vmem:[#allocation2] sm:$0xff]  ;;  %vm44_vm0 = vcmask 523264  }
  0x26   :  { %s55_s5 = sshll.u32 %s147_s4, 4  ;;  %s56_s5 = int_to_ptr.vmem [resolvable:$true] %s55_s5 }
  0x27   :  { %v39_v1 = vand.u32 127, %v38_v0  ;;  %s117_s1 = scalar_lea.vmem %s56_s5, 256  ;;  %p122_p3 = scmp.lt.s32.totalorder %s56_s5, %s56_s5 }
  0x28   :  { %p118_p2 = scmp.ne.s32.totalorder %s56_s5, %s117_s1  ;;  %p123_p4 = scmp.lt.s32.totalorder %s117_s1, %s117_s1 }
  0x29   :  { %v40_v2 = vmul.u32 2, %v39_v1 }
  0x2a   :  { %p124_p5 = por %p123_p4, %p122_p3 }
  0x2b   :  { %v41_v5 = vsub.s32 %v37_v3, %v40_v2 }
  0x2c   :  { %p125_p6 = pnand %p124_p5, %p118_p2 }
  0x2d   :  { %vm42_vm1 = vcmp.eq.s32.totalorder %v41_v5, 0  ;;  %vm46_vm2 = vcmp.eq.s32.totalorder %v41_v5, 1 }
  0x2e   :  { %v43_v6 = vsel %vm42_vm1, %v36_v4, 0.0  ;;  %v47_v7 = vsel %vm46_vm2, %v36_v4, 0.0 }
  0x2f   :  { %45 = vst.msk [vmem:[#allocation7] sm:$0xff] %vm44_vm0, %v43_v6  ;;  %49 = vst.msk [vmem:[#allocation7 + $0x8] sm:$0xff] %vm44_vm0, %v47_v7 }
  0x30   :  { %128 = shalt.err (!%p125_p6)
}
  0x31   :  { %s129_s8 = scalar_lea.hbm %s203_s2, 256 }
  0x32   :  { %p130_p7 = scmp.ne.s32.totalorder %s203_s2, %s129_s8  ;;  %p133_p8 = scmp.lt.u32.totalorder %s129_s8, %s203_s2 }
  0x34   :  { %p135_p9 = pnand %p133_p8, %p130_p7 }
  0x36   :  { %138 = shalt.err (!%p135_p9)
}
  0x37   :  { %s148_s13 = smov 128   ;;  %s149_s14 = smov 8  }
  0x38   :  { %61 = dma.vmem_to_hbm [thread:$0]  %s56_s5, 256, %s203_s2, [#allocation4], %s148_s13, %s148_s13, %s149_s14  }
  0x39   :  { %143 = dma.done.wait [#allocation4], 256  }
  0x3a   :  { %144 = vsyncadd [#allocation4], 4294967040 }
  0x3b   :  { %65 = vsyncpa [#allocation3], 1 }
  0x3c   :  { %66 = vsyncpa [#allocation6], 1 }
  0x3d   :  { %67 = vsyncpa [#allocation4], 1 }

</bundles_post_ra>
